<compile_context>
chip_gen: v7x
topology: tpu7x:2x2x1
jax: 0.10.0
libtpu: 0.0.40
codegen_flags: <defaults>
</compile_context>

<pallas_src>
import functools

import jax
import jax.numpy as jnp
from jax.experimental import pallas as pl
from jax.experimental.pallas import tpu as pltpu

LANE = 128
SUBLANE = 8


def _round_up(x, m):
    return ((x + m - 1) // m) * m


def _num_tensorcores():
    """2 on multi-TensorCore (megacore) chips, else 1.  Perf-only heuristic."""
    try:
        kind = jax.devices()[0].device_kind.lower()
    except Exception:
        return 1
    # Single-TensorCore chips.
    if any(s in kind for s in ("v5e", "v5 lite", "v5lite", "v6e", "v6 lite", "v6lite")):
        return 1
    # Megacore / dual-TensorCore chips.
    if any(s in kind for s in ("v4", "v5p", "v7")):
        return 2
    return 1


def _bce_with_logits(x, t):
    # Numerically stable softplus form: max(x,0) - x*t + log1p(exp(-|x|)).
    return jnp.maximum(x, 0.0) - x * t + jnp.log1p(jnp.exp(-jnp.abs(x)))


def _boundary_kernel(x_ref, t_ref,
                     pos_cnt_ref, neg_cnt_ref, pos_bce_ref, neg_bce_ref,
                     *, valid_rows, steps_per_core, chunk_rows):
    c = pl.program_id(0)   # core split (parallel; width 1 on single-TC chips)
    i = pl.program_id(1)   # streaming reduction (arbitrary)
    step = c * steps_per_core + i

    @pl.when(i == 0)
    def _():
        pos_cnt_ref[...] = jnp.zeros_like(pos_cnt_ref)
        neg_cnt_ref[...] = jnp.zeros_like(neg_cnt_ref)
        pos_bce_ref[...] = jnp.zeros_like(pos_bce_ref)
        neg_bce_ref[...] = jnp.zeros_like(neg_bce_ref)

    br, lane = x_ref.shape          # static block shape
    n_chunks = br // chunk_rows
    row_base = step * br            # global row index of this block's first row

    def fold(v):  # (chunk_rows, 128) -> (8, 128): pure VPU adds over leading axis
        return jnp.sum(v.reshape(chunk_rows // SUBLANE, SUBLANE, lane), axis=0)

    def process(masked):
        # Static-offset chunking bounds live temporaries to ~chunk_rows*128 f32
        # each while accumulating straight into the resident (8,128) outputs.
        for ci in range(n_chunks):
            off = ci * chunk_rows
            x = x_ref[pl.ds(off, chunk_rows), :].astype(jnp.float32)
            t = t_ref[pl.ds(off, chunk_rows), :].astype(jnp.float32)
            if masked:
                # Only rows past the true row count are invalid (the streamed
                # prefix is 128-aligned, so lane masking is never needed).
                rids = jax.lax.broadcasted_iota(jnp.int32, (chunk_rows, lane), 0)
                valid = (row_base + off + rids) < valid_rows
                x = jnp.where(valid, x, 0.0)    # keep garbage (possibly NaN) out
                t = jnp.where(valid, t, -1.0)   # neither 0 nor 1 -> contributes 0
            pos_f = (t == 1.0).astype(jnp.float32)
            neg_f = (t == 0.0).astype(jnp.float32)
            bce = _bce_with_logits(x, t)
            pos_cnt_ref[0] += fold(pos_f)
            neg_cnt_ref[0] += fold(neg_f)
            pos_bce_ref[0] += fold(pos_f * bce)
            neg_bce_ref[0] += fold(neg_f * bce)

    # Masking only runs on the partial last tile / clamped duplicate steps.
    is_tail = (row_base + br) > valid_rows

    @pl.when(jnp.logical_not(is_tail))
    def _():
        process(False)

    @pl.when(is_tail)
    def _():
        process(True)


def boundary_loss(inputs, targets, *, block_rows=4096, chunk_rows=512,
                  vmem_limit_bytes=48 * 1024 * 1024):
    """Pallas implementation of BoundaryLoss.forward (returns a scalar f32).

    Callers may pass bf16 logits and integer/bf16 targets to halve the HBM
    bytes streamed; the kernel upcasts chunk-by-chunk in VMEM.
    """
    if inputs.ndim == 3:
        inputs = inputs[:, None, :, :]
    # Match PyTorch exactly: inputs.permute(0,2,3,1).view(-1); targets.view(-1)
    x = jnp.transpose(inputs, (0, 2, 3, 1)).reshape(-1)
    t = targets.reshape(-1)
    n = int(x.shape[0])
    assert int(t.shape[0]) == n

    rows = n // LANE           # 128-aligned prefix streamed by the kernel
    rem = n - rows * LANE      # <128-element tail handled in the XLA epilogue

    pos_num = jnp.float32(0.0)
    neg_num = jnp.float32(0.0)
    s_pos = jnp.float32(0.0)
    s_neg = jnp.float32(0.0)

    if rows > 0:
        n_prefix = rows * LANE
        x2 = (x[:n_prefix] if rem else x).reshape(rows, LANE)
        t2 = (t[:n_prefix] if rem else t).reshape(rows, LANE)

        if rows <= block_rows:
            # Single tile: no chunking needed (tile itself is small).
            br = max(SUBLANE, _round_up(rows, SUBLANE))
            chunk = br
        else:
            assert block_rows % chunk_rows == 0 and chunk_rows % SUBLANE == 0
            br = block_rows
            chunk = chunk_rows

        cores = _num_tensorcores()
        num_tiles = -(-rows // br)
        if num_tiles < cores:
            cores = 1
        steps_per_core = -(-num_tiles // cores)
        last_tile = num_tiles - 1

        def in_map(c, i):
            # Clamp so DMA source blocks always start in-bounds; the kernel's
            # row-index mask zeroes any re-read / tail data.
            return (jnp.minimum(c * steps_per_core + i, last_tile), 0)

        kernel = functools.partial(
            _boundary_kernel,
            valid_rows=rows,
            steps_per_core=steps_per_core,
            chunk_rows=chunk,
        )

        acc_shape = jax.ShapeDtypeStruct((cores, SUBLANE, LANE), jnp.float32)
        acc_spec = pl.BlockSpec((1, SUBLANE, LANE), lambda c, i: (c, 0, 0))

        pos_cnt, neg_cnt, pos_bce, neg_bce = pl.pallas_call(
            kernel,
            out_shape=(acc_shape, acc_shape, acc_shape, acc_shape),
            grid_spec=pltpu.PrefetchScalarGridSpec(
                num_scalar_prefetch=0,
                grid=(cores, steps_per_core),
                in_specs=[
                    pl.BlockSpec((br, LANE), in_map),
                    pl.BlockSpec((br, LANE), in_map),
                ],
                out_specs=[acc_spec, acc_spec, acc_spec, acc_spec],
            ),
            compiler_params=pltpu.CompilerParams(
                dimension_semantics=("parallel", "arbitrary"),
                vmem_limit_bytes=vmem_limit_bytes,
            ),
        )(x2, t2)

        pos_num = jnp.sum(pos_cnt)
        neg_num = jnp.sum(neg_cnt)
        s_pos = jnp.sum(pos_bce)
        s_neg = jnp.sum(neg_bce)

    if rem:
        # Tiny (<128-element) tail: plain XLA, negligible cost, no input pad.
        xt = x[rows * LANE:].astype(jnp.float32)
        tt = t[rows * LANE:].astype(jnp.float32)
        p = (tt == 1.0).astype(jnp.float32)
        ng = (tt == 0.0).astype(jnp.float32)
        bce = _bce_with_logits(xt, tt)
        pos_num = pos_num + jnp.sum(p)
        neg_num = neg_num + jnp.sum(ng)
        s_pos = s_pos + jnp.sum(p * bce)
        s_neg = s_neg + jnp.sum(ng * bce)

    sum_num = pos_num + neg_num
    return (neg_num * s_pos + pos_num * s_neg) / (sum_num * jnp.float32(n))


def boundary_loss_ref(inputs, targets):
    """Pure-JAX reference mirroring the PyTorch forward."""
    if inputs.ndim == 3:
        inputs = inputs[:, None, :, :]
    x = jnp.transpose(inputs, (0, 2, 3, 1)).reshape(-1).astype(jnp.float32)
    t = targets.reshape(-1).astype(jnp.float32)
    pos = t == 1.0
    neg = t == 0.0
    pos_num = jnp.sum(pos).astype(jnp.float32)
    neg_num = jnp.sum(neg).astype(jnp.float32)
    sum_num = pos_num + neg_num
    weight = jnp.where(pos, neg_num / sum_num,
                       jnp.where(neg, pos_num / sum_num, 0.0))
    bce = jnp.maximum(x, 0.0) - x * t + jnp.log1p(jnp.exp(-jnp.abs(x)))
    return jnp.mean(weight * bce)


if __name__ == "__main__":
    key = jax.random.PRNGKey(0)
    k1, k2, k3, k4, k5, k6 = jax.random.split(key, 6)

    # Binary segmentation: logits (B, 1, H, W), targets (B, H, W) in {0, 1}.
    B, H, W = 2, 16, 16
    logits = jax.random.normal(k1, (B, 1, H, W), dtype=jnp.float32)
    targets = (jax.random.uniform(k2, (B, H, W)) > 0.5).astype(jnp.float32)
    loss = jax.block_until_ready(boundary_loss(logits, targets))
    ref = boundary_loss_ref(logits, targets)
    assert jnp.allclose(loss, ref, atol=1e-5, rtol=1e-5), (loss, ref)

    # Odd shape (3-D input path, n % 128 != 0 -> epilogue tail) with "ignore"
    # labels (==2) which get weight 0 and are excluded from pos/neg counts.
    B2, H2, W2 = 2, 25, 21
    logits2 = jax.random.normal(k3, (B2, H2, W2), dtype=jnp.float32)
    r = jax.random.uniform(k4, (B2, H2, W2))
    targets2 = jnp.where(r > 0.9, 2.0, (r > 0.45).astype(jnp.float32))
    loss2 = jax.block_until_ready(boundary_loss(logits2, targets2))
    ref2 = boundary_loss_ref(logits2, targets2)
    assert jnp.allclose(loss2, ref2, atol=1e-5, rtol=1e-5), (loss2, ref2)

    # Multi-channel + bf16 logits (reduced HBM traffic path), partial tail tile.
    B3, C3, H3, W3 = 2, 3, 40, 52
    logits3 = jax.random.normal(k5, (B3, C3, H3, W3), dtype=jnp.bfloat16)
    targets3 = (jax.random.uniform(k6, (B3 * C3 * H3 * W3,)) > 0.5).astype(jnp.float32)
    targets3 = targets3.reshape(B3, C3, H3, W3)  # flattened identically by both paths
    loss3 = jax.block_until_ready(boundary_loss(logits3, targets3))
    ref3 = boundary_loss_ref(logits3, targets3)
    assert jnp.allclose(loss3, ref3, atol=1e-5, rtol=1e-4), (loss3, ref3)

    print("KERNEL_OK")
</pallas_src>

<mosaic_0001>
module attributes {stable_mosaic.version = 11 : i64} {
  func.func @_boundary_kernel(%arg0: i32, %arg1: i32, %arg2: memref<8x128xf32, #tpu.memory_space<vmem>>, %arg3: memref<8x128xf32, #tpu.memory_space<vmem>>, %arg4: memref<1x8x128xf32, #tpu.memory_space<vmem>>, %arg5: memref<1x8x128xf32, #tpu.memory_space<vmem>>, %arg6: memref<1x8x128xf32, #tpu.memory_space<vmem>>, %arg7: memref<1x8x128xf32, #tpu.memory_space<vmem>>) attributes {dimension_semantics = [#tpu.dimension_semantics<parallel>, #tpu.dimension_semantics<arbitrary>], iteration_bounds = array<i64: 1, 1>, scalar_prefetch = 0 : i64, scratch_operands = 0 : i64, tpu.core_type = #tpu.core_type<tc>, window_params = [{transform_indices = @transform_0, window_bounds = array<i64: 8, 128>}, {transform_indices = @transform_1, window_bounds = array<i64: 8, 128>}, {transform_indices = @transform_2, window_bounds = array<i64: 1, 8, 128>}, {transform_indices = @transform_3, window_bounds = array<i64: 1, 8, 128>}, {transform_indices = @transform_4, window_bounds = array<i64: 1, 8, 128>}, {transform_indices = @transform_5, window_bounds = array<i64: 1, 8, 128>}]} {
    %c1_i32 = arith.constant 1 : i32
    %0 = arith.muli %arg0, %c1_i32 : i32
    %1 = arith.addi %0, %arg1 : i32
    %c0_i32 = arith.constant 0 : i32
    %2 = arith.cmpi eq, %arg1, %c0_i32 : i32
    %3 = arith.extui %2 : i1 to i32
    %c0_i32_0 = arith.constant 0 : i32
    %4 = arith.cmpi ne, %3, %c0_i32_0 : i32
    scf.if %4 {
      %cst = arith.constant 0.000000e+00 : f32
      %13 = vector.broadcast %cst : f32 to vector<1x8x128xf32>
      %c0 = arith.constant 0 : index
      %c0_4 = arith.constant 0 : index
      %c0_5 = arith.constant 0 : index
      %14 = vector.load %arg4[%c0, %c0_4, %c0_5] : memref<1x8x128xf32, #tpu.memory_space<vmem>>, vector<1x8x128xf32>
      tpu.vector_store %arg4[%c0, %c0_4, %c0_5], %13 {strides = array<i32>} : memref<1x8x128xf32, #tpu.memory_space<vmem>>, vector<1x8x128xf32>,
      %cst_6 = arith.constant 0.000000e+00 : f32
      %15 = vector.broadcast %cst_6 : f32 to vector<1x8x128xf32>
      %c0_7 = arith.constant 0 : index
      %c0_8 = arith.constant 0 : index
      %c0_9 = arith.constant 0 : index
      %16 = vector.load %arg5[%c0_7, %c0_8, %c0_9] : memref<1x8x128xf32, #tpu.memory_space<vmem>>, vector<1x8x128xf32>
      tpu.vector_store %arg5[%c0_7, %c0_8, %c0_9], %15 {strides = array<i32>} : memref<1x8x128xf32, #tpu.memory_space<vmem>>, vector<1x8x128xf32>,
      %cst_10 = arith.constant 0.000000e+00 : f32
      %17 = vector.broadcast %cst_10 : f32 to vector<1x8x128xf32>
      %c0_11 = arith.constant 0 : index
      %c0_12 = arith.constant 0 : index
      %c0_13 = arith.constant 0 : index
      %18 = vector.load %arg6[%c0_11, %c0_12, %c0_13] : memref<1x8x128xf32, #tpu.memory_space<vmem>>, vector<1x8x128xf32>
      tpu.vector_store %arg6[%c0_11, %c0_12, %c0_13], %17 {strides = array<i32>} : memref<1x8x128xf32, #tpu.memory_space<vmem>>, vector<1x8x128xf32>,
      %cst_14 = arith.constant 0.000000e+00 : f32
      %19 = vector.broadcast %cst_14 : f32 to vector<1x8x128xf32>
      %c0_15 = arith.constant 0 : index
      %c0_16 = arith.constant 0 : index
      %c0_17 = arith.constant 0 : index
      %20 = vector.load %arg7[%c0_15, %c0_16, %c0_17] : memref<1x8x128xf32, #tpu.memory_space<vmem>>, vector<1x8x128xf32>
      tpu.vector_store %arg7[%c0_15, %c0_16, %c0_17], %19 {strides = array<i32>} : memref<1x8x128xf32, #tpu.memory_space<vmem>>, vector<1x8x128xf32>,
    } else {
    }
    %c8_i32 = arith.constant 8 : i32
    %5 = arith.muli %1, %c8_i32 : i32
    %c8_i32_1 = arith.constant 8 : i32
    %6 = arith.addi %5, %c8_i32_1 : i32
    %c4_i32 = arith.constant 4 : i32
    %7 = arith.cmpi sgt, %6, %c4_i32 : i32
    %true = arith.constant true
    %8 = arith.xori %7, %true : i1
    %9 = arith.extui %8 : i1 to i32
    %c0_i32_2 = arith.constant 0 : i32
    %10 = arith.cmpi ne, %9, %c0_i32_2 : i32
    scf.if %10 {
      %c0 = arith.constant 0 : index
      %c0_4 = arith.constant 0 : index
      %13 = vector.load %arg2[%c0, %c0_4] : memref<8x128xf32, #tpu.memory_space<vmem>>, vector<8x128xf32>
      %c0_5 = arith.constant 0 : index
      %c0_6 = arith.constant 0 : index
      %14 = vector.load %arg3[%c0_5, %c0_6] : memref<8x128xf32, #tpu.memory_space<vmem>>, vector<8x128xf32>
      %cst = arith.constant 1.000000e+00 : f32
      %15 = vector.broadcast %cst : f32 to vector<8x128xf32>
      %16 = arith.cmpf oeq, %14, %15 : vector<8x128xf32>
      %17 = arith.extui %16 : vector<8x128xi1> to vector<8x128xi32>
      %18 = arith.sitofp %17 : vector<8x128xi32> to vector<8x128xf32>
      %cst_7 = arith.constant 0.000000e+00 : f32
      %19 = vector.broadcast %cst_7 : f32 to vector<8x128xf32>
      %20 = arith.cmpf oeq, %14, %19 : vector<8x128xf32>
      %21 = arith.extui %20 : vector<8x128xi1> to vector<8x128xi32>
      %22 = arith.sitofp %21 : vector<8x128xi32> to vector<8x128xf32>
      %cst_8 = arith.constant 0.000000e+00 : f32
      %23 = vector.broadcast %cst_8 : f32 to vector<8x128xf32>
      %24 = arith.maximumf %13, %23 : vector<8x128xf32>
      %25 = arith.mulf %13, %14 : vector<8x128xf32>
      %26 = arith.subf %24, %25 : vector<8x128xf32>
      %27 = math.absf %13 : vector<8x128xf32>
      %cst_9 = arith.constant 0.000000e+00 : f32
      %28 = vector.broadcast %cst_9 : f32 to vector<8x128xf32>
      %29 = arith.subf %28, %27 : vector<8x128xf32>
      %30 = math.exp %29 : vector<8x128xf32>
      %31 = math.log1p %30 : vector<8x128xf32>
      %32 = arith.addf %26, %31 : vector<8x128xf32>
      %c0_10 = arith.constant 0 : index
      %c0_11 = arith.constant 0 : index
      %c0_12 = arith.constant 0 : index
      %33 = vector.load %arg4[%c0_10, %c0_11, %c0_12] : memref<1x8x128xf32, #tpu.memory_space<vmem>>, vector<1x8x128xf32>
      %34 = vector.shape_cast %33 : vector<1x8x128xf32> to vector<8x128xf32>
      %35 = vector.shape_cast %18 : vector<8x128xf32> to vector<1x8x128xf32>
      %cst_13 = arith.constant dense<0.000000e+00> : vector<8x128xf32>
      %36 = vector.multi_reduction <add>, %35, %cst_13 [0] : vector<1x8x128xf32> to vector<8x128xf32>
      %37 = arith.addf %34, %36 : vector<8x128xf32>
      %c0_14 = arith.constant 0 : index
      %c0_15 = arith.constant 0 : index
      %c0_16 = arith.constant 0 : index
      %38 = vector.load %arg4[%c0_14, %c0_15, %c0_16] : memref<1x8x128xf32, #tpu.memory_space<vmem>>, vector<1x8x128xf32>
      %39 = vector.shape_cast %38 : vector<1x8x128xf32> to vector<8x128xf32>
      %40 = vector.shape_cast %37 : vector<8x128xf32> to vector<1x8x128xf32>
      tpu.vector_store %arg4[%c0_14, %c0_15, %c0_16], %40 {strides = array<i32>} : memref<1x8x128xf32, #tpu.memory_space<vmem>>, vector<1x8x128xf32>,
      %c0_17 = arith.constant 0 : index
      %c0_18 = arith.constant 0 : index
      %c0_19 = arith.constant 0 : index
      %41 = vector.load %arg5[%c0_17, %c0_18, %c0_19] : memref<1x8x128xf32, #tpu.memory_space<vmem>>, vector<1x8x128xf32>
      %42 = vector.shape_cast %41 : vector<1x8x128xf32> to vector<8x128xf32>
      %43 = vector.shape_cast %22 : vector<8x128xf32> to vector<1x8x128xf32>
      %cst_20 = arith.constant dense<0.000000e+00> : vector<8x128xf32>
      %44 = vector.multi_reduction <add>, %43, %cst_20 [0] : vector<1x8x128xf32> to vector<8x128xf32>
      %45 = arith.addf %42, %44 : vector<8x128xf32>
      %c0_21 = arith.constant 0 : index
      %c0_22 = arith.constant 0 : index
      %c0_23 = arith.constant 0 : index
      %46 = vector.load %arg5[%c0_21, %c0_22, %c0_23] : memref<1x8x128xf32, #tpu.memory_space<vmem>>, vector<1x8x128xf32>
      %47 = vector.shape_cast %46 : vector<1x8x128xf32> to vector<8x128xf32>
      %48 = vector.shape_cast %45 : vector<8x128xf32> to vector<1x8x128xf32>
      tpu.vector_store %arg5[%c0_21, %c0_22, %c0_23], %48 {strides = array<i32>} : memref<1x8x128xf32, #tpu.memory_space<vmem>>, vector<1x8x128xf32>,
      %c0_24 = arith.constant 0 : index
      %c0_25 = arith.constant 0 : index
      %c0_26 = arith.constant 0 : index
      %49 = vector.load %arg6[%c0_24, %c0_25, %c0_26] : memref<1x8x128xf32, #tpu.memory_space<vmem>>, vector<1x8x128xf32>
      %50 = vector.shape_cast %49 : vector<1x8x128xf32> to vector<8x128xf32>
      %51 = arith.mulf %18, %32 : vector<8x128xf32>
      %52 = vector.shape_cast %51 : vector<8x128xf32> to vector<1x8x128xf32>
      %cst_27 = arith.constant dense<0.000000e+00> : vector<8x128xf32>
      %53 = vector.multi_reduction <add>, %52, %cst_27 [0] : vector<1x8x128xf32> to vector<8x128xf32>
      %54 = arith.addf %50, %53 : vector<8x128xf32>
      %c0_28 = arith.constant 0 : index
      %c0_29 = arith.constant 0 : index
      %c0_30 = arith.constant 0 : index
      %55 = vector.load %arg6[%c0_28, %c0_29, %c0_30] : memref<1x8x128xf32, #tpu.memory_space<vmem>>, vector<1x8x128xf32>
      %56 = vector.shape_cast %55 : vector<1x8x128xf32> to vector<8x128xf32>
      %57 = vector.shape_cast %54 : vector<8x128xf32> to vector<1x8x128xf32>
      tpu.vector_store %arg6[%c0_28, %c0_29, %c0_30], %57 {strides = array<i32>} : memref<1x8x128xf32, #tpu.memory_space<vmem>>, vector<1x8x128xf32>,
      %c0_31 = arith.constant 0 : index
      %c0_32 = arith.constant 0 : index
      %c0_33 = arith.constant 0 : index
      %58 = vector.load %arg7[%c0_31, %c0_32, %c0_33] : memref<1x8x128xf32, #tpu.memory_space<vmem>>, vector<1x8x128xf32>
      %59 = vector.shape_cast %58 : vector<1x8x128xf32> to vector<8x128xf32>
      %60 = arith.mulf %22, %32 : vector<8x128xf32>
      %61 = vector.shape_cast %60 : vector<8x128xf32> to vector<1x8x128xf32>
      %cst_34 = arith.constant dense<0.000000e+00> : vector<8x128xf32>
      %62 = vector.multi_reduction <add>, %61, %cst_34 [0] : vector<1x8x128xf32> to vector<8x128xf32>
      %63 = arith.addf %59, %62 : vector<8x128xf32>
      %c0_35 = arith.constant 0 : index
      %c0_36 = arith.constant 0 : index
      %c0_37 = arith.constant 0 : index
      %64 = vector.load %arg7[%c0_35, %c0_36, %c0_37] : memref<1x8x128xf32, #tpu.memory_space<vmem>>, vector<1x8x128xf32>
      %65 = vector.shape_cast %64 : vector<1x8x128xf32> to vector<8x128xf32>
      %66 = vector.shape_cast %63 : vector<8x128xf32> to vector<1x8x128xf32>
      tpu.vector_store %arg7[%c0_35, %c0_36, %c0_37], %66 {strides = array<i32>} : memref<1x8x128xf32, #tpu.memory_space<vmem>>, vector<1x8x128xf32>,
    } else {
    }
    %11 = arith.extui %7 : i1 to i32
    %c0_i32_3 = arith.constant 0 : i32
    %12 = arith.cmpi ne, %11, %c0_i32_3 : i32
    scf.if %12 {
      %c0 = arith.constant 0 : index
      %c0_4 = arith.constant 0 : index
      %13 = vector.load %arg2[%c0, %c0_4] : memref<8x128xf32, #tpu.memory_space<vmem>>, vector<8x128xf32>
      %c0_5 = arith.constant 0 : index
      %c0_6 = arith.constant 0 : index
      %14 = vector.load %arg3[%c0_5, %c0_6] : memref<8x128xf32, #tpu.memory_space<vmem>>, vector<8x128xf32>
      %15 = tpu.iota {dimensions = array<i32: 0>} : vector<8x128xi32>
      %c0_i32_7 = arith.constant 0 : i32
      %16 = arith.addi %5, %c0_i32_7 : i32
      %17 = vector.broadcast %16 : i32 to vector<8x128xi32>
      %18 = arith.addi %17, %15 : vector<8x128xi32>
      %c4_i32_8 = arith.constant 4 : i32
      %19 = vector.broadcast %c4_i32_8 : i32 to vector<8x128xi32>
      %20 = arith.cmpi slt, %18, %19 : vector<8x128xi32>
      %cst = arith.constant 0.000000e+00 : f32
      %21 = vector.broadcast %cst : f32 to vector<8x128xf32>
      %22 = arith.select %20, %13, %21 : vector<8x128xi1>, vector<8x128xf32>
      %cst_9 = arith.constant -1.000000e+00 : f32
      %23 = vector.broadcast %cst_9 : f32 to vector<8x128xf32>
      %24 = arith.select %20, %14, %23 : vector<8x128xi1>, vector<8x128xf32>
      %cst_10 = arith.constant 1.000000e+00 : f32
      %25 = vector.broadcast %cst_10 : f32 to vector<8x128xf32>
      %26 = arith.cmpf oeq, %24, %25 : vector<8x128xf32>
      %27 = arith.extui %26 : vector<8x128xi1> to vector<8x128xi32>
      %28 = arith.sitofp %27 : vector<8x128xi32> to vector<8x128xf32>
      %cst_11 = arith.constant 0.000000e+00 : f32
      %29 = vector.broadcast %cst_11 : f32 to vector<8x128xf32>
      %30 = arith.cmpf oeq, %24, %29 : vector<8x128xf32>
      %31 = arith.extui %30 : vector<8x128xi1> to vector<8x128xi32>
      %32 = arith.sitofp %31 : vector<8x128xi32> to vector<8x128xf32>
      %cst_12 = arith.constant 0.000000e+00 : f32
      %33 = vector.broadcast %cst_12 : f32 to vector<8x128xf32>
      %34 = arith.maximumf %22, %33 : vector<8x128xf32>
      %35 = arith.mulf %22, %24 : vector<8x128xf32>
      %36 = arith.subf %34, %35 : vector<8x128xf32>
      %37 = math.absf %22 : vector<8x128xf32>
      %cst_13 = arith.constant 0.000000e+00 : f32
      %38 = vector.broadcast %cst_13 : f32 to vector<8x128xf32>
      %39 = arith.subf %38, %37 : vector<8x128xf32>
      %40 = math.exp %39 : vector<8x128xf32>
      %41 = math.log1p %40 : vector<8x128xf32>
      %42 = arith.addf %36, %41 : vector<8x128xf32>
      %c0_14 = arith.constant 0 : index
      %c0_15 = arith.constant 0 : index
      %c0_16 = arith.constant 0 : index
      %43 = vector.load %arg4[%c0_14, %c0_15, %c0_16] : memref<1x8x128xf32, #tpu.memory_space<vmem>>, vector<1x8x128xf32>
      %44 = vector.shape_cast %43 : vector<1x8x128xf32> to vector<8x128xf32>
      %45 = vector.shape_cast %28 : vector<8x128xf32> to vector<1x8x128xf32>
      %cst_17 = arith.constant dense<0.000000e+00> : vector<8x128xf32>
      %46 = vector.multi_reduction <add>, %45, %cst_17 [0] : vector<1x8x128xf32> to vector<8x128xf32>
      %47 = arith.addf %44, %46 : vector<8x128xf32>
      %c0_18 = arith.constant 0 : index
      %c0_19 = arith.constant 0 : index
      %c0_20 = arith.constant 0 : index
      %48 = vector.load %arg4[%c0_18, %c0_19, %c0_20] : memref<1x8x128xf32, #tpu.memory_space<vmem>>, vector<1x8x128xf32>
      %49 = vector.shape_cast %48 : vector<1x8x128xf32> to vector<8x128xf32>
      %50 = vector.shape_cast %47 : vector<8x128xf32> to vector<1x8x128xf32>
      tpu.vector_store %arg4[%c0_18, %c0_19, %c0_20], %50 {strides = array<i32>} : memref<1x8x128xf32, #tpu.memory_space<vmem>>, vector<1x8x128xf32>,
      %c0_21 = arith.constant 0 : index
      %c0_22 = arith.constant 0 : index
      %c0_23 = arith.constant 0 : index
      %51 = vector.load %arg5[%c0_21, %c0_22, %c0_23] : memref<1x8x128xf32, #tpu.memory_space<vmem>>, vector<1x8x128xf32>
      %52 = vector.shape_cast %51 : vector<1x8x128xf32> to vector<8x128xf32>
      %53 = vector.shape_cast %32 : vector<8x128xf32> to vector<1x8x128xf32>
      %cst_24 = arith.constant dense<0.000000e+00> : vector<8x128xf32>
      %54 = vector.multi_reduction <add>, %53, %cst_24 [0] : vector<1x8x128xf32> to vector<8x128xf32>
      %55 = arith.addf %52, %54 : vector<8x128xf32>
      %c0_25 = arith.constant 0 : index
      %c0_26 = arith.constant 0 : index
      %c0_27 = arith.constant 0 : index
      %56 = vector.load %arg5[%c0_25, %c0_26, %c0_27] : memref<1x8x128xf32, #tpu.memory_space<vmem>>, vector<1x8x128xf32>
      %57 = vector.shape_cast %56 : vector<1x8x128xf32> to vector<8x128xf32>
      %58 = vector.shape_cast %55 : vector<8x128xf32> to vector<1x8x128xf32>
      tpu.vector_store %arg5[%c0_25, %c0_26, %c0_27], %58 {strides = array<i32>} : memref<1x8x128xf32, #tpu.memory_space<vmem>>, vector<1x8x128xf32>,
      %c0_28 = arith.constant 0 : index
      %c0_29 = arith.constant 0 : index
      %c0_30 = arith.constant 0 : index
      %59 = vector.load %arg6[%c0_28, %c0_29, %c0_30] : memref<1x8x128xf32, #tpu.memory_space<vmem>>, vector<1x8x128xf32>
      %60 = vector.shape_cast %59 : vector<1x8x128xf32> to vector<8x128xf32>
      %61 = arith.mulf %28, %42 : vector<8x128xf32>
      %62 = vector.shape_cast %61 : vector<8x128xf32> to vector<1x8x128xf32>
      %cst_31 = arith.constant dense<0.000000e+00> : vector<8x128xf32>
      %63 = vector.multi_reduction <add>, %62, %cst_31 [0] : vector<1x8x128xf32> to vector<8x128xf32>
      %64 = arith.addf %60, %63 : vector<8x128xf32>
      %c0_32 = arith.constant 0 : index
      %c0_33 = arith.constant 0 : index
      %c0_34 = arith.constant 0 : index
      %65 = vector.load %arg6[%c0_32, %c0_33, %c0_34] : memref<1x8x128xf32, #tpu.memory_space<vmem>>, vector<1x8x128xf32>
      %66 = vector.shape_cast %65 : vector<1x8x128xf32> to vector<8x128xf32>
      %67 = vector.shape_cast %64 : vector<8x128xf32> to vector<1x8x128xf32>
      tpu.vector_store %arg6[%c0_32, %c0_33, %c0_34], %67 {strides = array<i32>} : memref<1x8x128xf32, #tpu.memory_space<vmem>>, vector<1x8x128xf32>,
      %c0_35 = arith.constant 0 : index
      %c0_36 = arith.constant 0 : index
      %c0_37 = arith.constant 0 : index
      %68 = vector.load %arg7[%c0_35, %c0_36, %c0_37] : memref<1x8x128xf32, #tpu.memory_space<vmem>>, vector<1x8x128xf32>
      %69 = vector.shape_cast %68 : vector<1x8x128xf32> to vector<8x128xf32>
      %70 = arith.mulf %32, %42 : vector<8x128xf32>
      %71 = vector.shape_cast %70 : vector<8x128xf32> to vector<1x8x128xf32>
      %cst_38 = arith.constant dense<0.000000e+00> : vector<8x128xf32>
      %72 = vector.multi_reduction <add>, %71, %cst_38 [0] : vector<1x8x128xf32> to vector<8x128xf32>
      %73 = arith.addf %69, %72 : vector<8x128xf32>
      %c0_39 = arith.constant 0 : index
      %c0_40 = arith.constant 0 : index
      %c0_41 = arith.constant 0 : index
      %74 = vector.load %arg7[%c0_39, %c0_40, %c0_41] : memref<1x8x128xf32, #tpu.memory_space<vmem>>, vector<1x8x128xf32>
      %75 = vector.shape_cast %74 : vector<1x8x128xf32> to vector<8x128xf32>
      %76 = vector.shape_cast %73 : vector<8x128xf32> to vector<1x8x128xf32>
      tpu.vector_store %arg7[%c0_39, %c0_40, %c0_41], %76 {strides = array<i32>} : memref<1x8x128xf32, #tpu.memory_space<vmem>>, vector<1x8x128xf32>,
    } else {
    }
    return
  }
  func.func @transform_0(%arg0: i32, %arg1: i32) -> (i32, i32) {
    %c1_i32 = arith.constant 1 : i32
    %0 = arith.muli %arg0, %c1_i32 : i32
    %1 = arith.addi %0, %arg1 : i32
    %c0_i32 = arith.constant 0 : i32
    %2 = arith.minsi %1, %c0_i32 : i32
    %c0_i32_0 = arith.constant 0 : i32
    %c0_i32_1 = arith.constant 0 : i32
    return %2, %c0_i32_0 : i32, i32
  }
  func.func @transform_1(%arg0: i32, %arg1: i32) -> (i32, i32) {
    %c1_i32 = arith.constant 1 : i32
    %0 = arith.muli %arg0, %c1_i32 : i32
    %1 = arith.addi %0, %arg1 : i32
    %c0_i32 = arith.constant 0 : i32
    %2 = arith.minsi %1, %c0_i32 : i32
    %c0_i32_0 = arith.constant 0 : i32
    %c0_i32_1 = arith.constant 0 : i32
    return %2, %c0_i32_0 : i32, i32
  }
  func.func @transform_2(%arg0: i32, %arg1: i32) -> (i32, i32, i32) {
    %c0_i32 = arith.constant 0 : i32
    %c0_i32_0 = arith.constant 0 : i32
    %c0_i32_1 = arith.constant 0 : i32
    return %arg0, %c0_i32, %c0_i32_0 : i32, i32, i32
  }
  func.func @transform_3(%arg0: i32, %arg1: i32) -> (i32, i32, i32) {
    %c0_i32 = arith.constant 0 : i32
    %c0_i32_0 = arith.constant 0 : i32
    %c0_i32_1 = arith.constant 0 : i32
    return %arg0, %c0_i32, %c0_i32_0 : i32, i32, i32
  }
  func.func @transform_4(%arg0: i32, %arg1: i32) -> (i32, i32, i32) {
    %c0_i32 = arith.constant 0 : i32
    %c0_i32_0 = arith.constant 0 : i32
    %c0_i32_1 = arith.constant 0 : i32
    return %arg0, %c0_i32, %c0_i32_0 : i32, i32, i32
  }
  func.func @transform_5(%arg0: i32, %arg1: i32) -> (i32, i32, i32) {
    %c0_i32 = arith.constant 0 : i32
    %c0_i32_0 = arith.constant 0 : i32
    %c0_i32_1 = arith.constant 0 : i32
    return %arg0, %c0_i32, %c0_i32_0 : i32, i32, i32
  }
}

</mosaic_0001>

<bundles_post_ra>
// kernel: tpu_custom_call.1
= control target key start
LH: loop header
LB: loop body
LE: loop exit
PB: predicated region body
PF: predicated region fallthrough
CT: control target
= control target key end

     0   :  { %11 = vsyncpa [#allocation3], 0  ;;  %s528_s0 = inlined_call_operand.hbm [shape: f32[4,128], index: 0, kind: input, shape index: {}]   ;;  %s529_s1 = inlined_call_operand.hbm [shape: f32[4,128], index: 1, kind: input, shape index: {}]   ;;  %s530_s2 = inlined_call_operand.hbm [shape: f32[1,8,128], index: 2, kind: output, shape index: {0}]   ;;  %s531_s3 = inlined_call_operand.hbm [shape: f32[1,8,128], index: 3, kind: output, shape index: {1}]   ;;  %s532_s4 = inlined_call_operand.hbm [shape: f32[1,8,128], index: 4, kind: output, shape index: {2}]   ;;  %s533_s5 = inlined_call_operand.hbm [shape: f32[1,8,128], index: 5, kind: output, shape index: {3}]  }
   0x1   :  { %12 = vsyncpa [#allocation6], 0 }
   0x2   :  { %13 = vsyncpa [#allocation4], 0 }
   0x3   :  { %14 = vsyncpa [#allocation9], 0 }
   0x4   :  { %15 = vsyncpa [#allocation12], 0 }
   0x5   :  { %26 = vsyncadd [#allocation3], 64  ;;  %s410_s18 = smov [#allocation2]   ;;  %s268_s22 = scalar_lea.hbm %s528_s0, 64 }
   0x6   :  { %s31_s19 = sshll.u32 %s410_s18, 4  ;;  %p269_p0 = scmp.ne.s32.totalorder %s528_s0, %s268_s22  ;;  %s32_s19 = int_to_ptr.vmem [resolvable:$true] %s31_s19 }
   0x7   :  { %p272_p1 = scmp.lt.u32.totalorder %s268_s22, %s528_s0 }
   0x9   :  { %p274_p2 = pnand %p272_p1, %p269_p0 }
   0xb   :  { %277 = shalt.err (!%p274_p2)
}
   0xc   :  { %s278_s27 = scalar_lea.vmem %s32_s19, 64  ;;  %s282_s28 = scalar_lea.vmem %s32_s19, 128 }
   0xd   :  { %p279_p3 = scmp.ne.s32.totalorder %s32_s19, %s278_s27  ;;  %p283_p4 = scmp.lt.s32.totalorder %s32_s19, %s32_s19 }
   0xe   :  { %p284_p5 = scmp.lt.s32.totalorder %s282_s28, %s278_s27 }
  0x10   :  { %p285_p6 = por %p284_p5, %p283_p4 }
  0x12   :  { %p286_p7 = pnand %p285_p6, %p279_p3 }
  0x14   :  { %289 = shalt.err (!%p286_p7)
}
  0x15   :  { %s411_s29 = smov 64   ;;  %s412_s30 = smov 4  }
  0x16   :  { %37 = dma.hbm_to_vmem [thread:$0]  %s528_s0, 64, %s32_s19, [#allocation3], %s411_s29, %s411_s29, %s412_s30  }
  0x17   :  { %48 = vsyncadd [#allocation6], 64  ;;  %s413_s8 = smov [#allocation5]   ;;  %s290_s12 = scalar_lea.hbm %s529_s1, 64 }
  0x18   :  { %s53_s9 = sshll.u32 %s413_s8, 4  ;;  %p291_p8 = scmp.ne.s32.totalorder %s529_s1, %s290_s12  ;;  %s54_s9 = int_to_ptr.vmem [resolvable:$true] %s53_s9 }
  0x19   :  { %p294_p9 = scmp.lt.u32.totalorder %s290_s12, %s529_s1 }
  0x1b   :  { %p296_p10 = pnand %p294_p9, %p291_p8 }
  0x1d   :  { %299 = shalt.err (!%p296_p10)
}
  0x1e   :  { %s300_s17 = scalar_lea.vmem %s54_s9, 64  ;;  %s304_s0 = scalar_lea.vmem %s54_s9, 128 }
  0x1f   :  { %p301_p11 = scmp.ne.s32.totalorder %s54_s9, %s300_s17  ;;  %p305_p12 = scmp.lt.s32.totalorder %s54_s9, %s54_s9 }
  0x20   :  { %p306_p13 = scmp.lt.s32.totalorder %s304_s0, %s300_s17 }
  0x22   :  { %p307_p0 = por %p306_p13, %p305_p12 }
  0x24   :  { %p308_p1 = pnand %p307_p0, %p301_p11 }
  0x26   :  { %311 = shalt.err (!%p308_p1)
}
  0x27   :  { %59 = dma.hbm_to_vmem [thread:$0]  %s529_s1, 64, %s54_s9, [#allocation6], %s411_s29, %s411_s29, %s412_s30  }
  0x28   :  { %400 = dma.done.wait [#allocation3], 128  }
  0x29   :  { %401 = vsyncadd [#allocation3], 4294967168 }
  0x2a   :  { %402 = dma.done.wait [#allocation6], 128  }
  0x2b   :  { %403 = vsyncadd [#allocation6], 4294967168  ;;  %v142_v0 = vlaneseq  ;;  %v140_v2 = vld [vmem:[#allocation2] sm:$0xff]  ;;  %v141_v3 = vld [vmem:[#allocation5] sm:$0xff]  ;;  %s414_s20 = smov [#allocation8]   ;;  %s415_s22 = smov [#allocation7]  }
  0x2c   :  { %s206_s21 = sshll.u32 %s414_s20, 4  ;;  %s196_s23 = sshll.u32 %s415_s22, 4  ;;  %v416_v7 = vmov 0.0   ;;  %s207_s21 = int_to_ptr.vmem [resolvable:$true] %s206_s21  ;;  %s473_s23 = int_to_ptr.vmem [resolvable:$true] %s196_s23 }
  0x2d   :  { %v143_v1 = vshrl.u32 %v142_v0, 7  ;;  %s312_s1 = scalar_lea.vmem %s207_s21, 128  ;;  %p317_p3 = scmp.lt.s32.totalorder %s207_s21, %s207_s21 }
  0x2e   :  { %p313_p2 = scmp.ne.s32.totalorder %s207_s21, %s312_s1  ;;  %p318_p4 = scmp.lt.s32.totalorder %s312_s1, %s312_s1 }
  0x2f   :  { %vm146_vm0 = vcmp.lt.s32.totalorder %v143_v1, 4 }
  0x30   :  { %v147_v4 = vsel %vm146_vm0, %v140_v2, 0.0  ;;  %v148_v5 = vsel %vm146_vm0, %v141_v3, -1.0  ;;  %p319_p5 = por %p318_p4, %p317_p3 }
  0x31   :  { %vm152_vm1 = vcmp.eq.f32.partialorder %v148_v5, 0.0  ;;  %v158_v6 = vand.u32 2147483647, %v147_v4  ;;  %vm149_vm2 = vcmp.eq.f32.partialorder %v148_v5, 1.0 }
  0x32   :  { %v254_v8 = vsel %vm152_vm1, 1.0, %v416_v7  ;;  %v253_v9 = vsel %vm149_vm2, 1.0, %v416_v7  ;;  %p320_p6 = pnand %p319_p5, %p313_p2 }
  0x33   :  { %v159_v10 = vsub.f32 0.0, %v158_v6  ;;  %179 = vst [vmem:[#allocation8] sm:$0xff] %v254_v8  ;;  %175 = vst [vmem:[#allocation7] sm:$0xff] %v253_v9 }
  0x35   :  { %v160_v11 = vmul.f32 1.442695, %v159_v10 }
  0x36   :  { %323 = shalt.err (!%p320_p6)
}
  0x37   :  { %s324_s26 = scalar_lea.hbm %s531_s3, 128 }
  0x38   :  { %p325_p7 = scmp.ne.s32.totalorder %s531_s3, %s324_s26  ;;  %p328_p8 = scmp.lt.u32.totalorder %s324_s26, %s531_s3 }
  0x3a   :  { %p330_p9 = pnand %p328_p8, %p325_p7 }
  0x3c   :  { %333 = shalt.err (!%p330_p9)
}
  0x3d   :  { %209 = dma.vmem_to_hbm [thread:$0]  %s207_s21, 128, %s531_s3, [#allocation9]   ;;  %264 = vpow2.f32 %v160_v11 }
  0x3e   :  { %s334_s8 = scalar_lea.vmem %s473_s23, 128  ;;  %p339_p11 = scmp.lt.s32.totalorder %s473_s23, %s473_s23 }
  0x3f   :  { %p335_p10 = scmp.ne.s32.totalorder %s473_s23, %s334_s8  ;;  %p340_p12 = scmp.lt.s32.totalorder %s334_s8, %s334_s8 }
  0x41   :  { %p341_p13 = por %p340_p12, %p339_p11 }
  0x43   :  { %p342_p0 = pnand %p341_p13, %p335_p10 }
  0x45   :  { %345 = shalt.err (!%p342_p0)
}
  0x46   :  { %s346_s11 = scalar_lea.hbm %s530_s2, 128 }
  0x47   :  { %p347_p1 = scmp.ne.s32.totalorder %s530_s2, %s346_s11  ;;  %p350_p2 = scmp.lt.u32.totalorder %s346_s11, %s530_s2 }
  0x49   :  { %p352_p3 = pnand %p350_p2, %p347_p1 }
  0x4b   :  { %355 = shalt.err (!%p352_p3)
}
  0x4c   :  { %199 = dma.vmem_to_hbm [thread:$0]  %s473_s23, 128, %s530_s2, [#allocation4]   ;;  %v265_v12 = vpop.eup %264  ;;  %v156_v16 = vmul.f32 %v148_v5, %v147_v4  ;;  %v155_v17 = vmax.f32 %v147_v4, 0.0 }
  0x4d   :  { %v162_v13 = vadd.f32 1.0, %v265_v12  ;;  %v165_v14 = vmul.f32 -0.5, %v265_v12  ;;  %v168_v18 = vand.u32 2147483647, %v265_v12  ;;  %s417_s17 = smov [#allocation10]   ;;  %s418_s2 = smov [#allocation11]  }
  0x4e   :  { %v157_v21 = vsub.f32 %v155_v17, %v156_v16  ;;  %s216_s0 = sshll.u32 %s417_s17, 4  ;;  %s226_s18 = sshll.u32 %s418_s2, 4  ;;  %s217_s0 = int_to_ptr.vmem [resolvable:$true] %s216_s0  ;;  %s227_s18 = int_to_ptr.vmem [resolvable:$true] %s226_s18 }
  0x4f   :  { %266 = vlog2.f32 %v162_v13  ;;  %v166_v15 = vadd.f32 1.0, %v165_v14  ;;  %vm169_vm3 = vcmp.lt.f32.partialorder %v168_v18, 0.0004427343  ;;  %s356_s19 = scalar_lea.vmem %s217_s0, 128  ;;  %p361_p5 = scmp.lt.s32.totalorder %s217_s0, %s217_s0 }
  0x50   :  { %p357_p4 = scmp.ne.s32.totalorder %s217_s0, %s356_s19  ;;  %p362_p6 = scmp.lt.s32.totalorder %s356_s19, %s356_s19 }
  0x51   :  { %v167_v19 = vmul.f32 %v265_v12, %v166_v15 }
  0x52   :  { %p363_p7 = por %p362_p6, %p361_p5 }
  0x54   :  { %p364_p8 = pnand %p363_p7, %p357_p4 }
  0x59   :  { %v267_v20 = vpop.eup %266 }
  0x5a   :  { %v164_v22 = vmul.f32 0.6931472, %v267_v20 }
  0x5c   :  { %v170_v23 = vsel %vm169_vm3, %v167_v19, %v164_v22 }
  0x5d   :  { %v171_v24 = vadd.f32 %v170_v23, %v157_v21 }
  0x5f   :  { %v181_v25 = vmul.f32 %v253_v9, %v171_v24  ;;  %v186_v26 = vmul.f32 %v254_v8, %v171_v24 }
  0x61   :  { %184 = vst [vmem:[#allocation10] sm:$0xff] %v181_v25  ;;  %189 = vst [vmem:[#allocation11] sm:$0xff] %v186_v26 }
  0x62   :  { %367 = shalt.err (!%p364_p8)
}
  0x63   :  { %s368_s22 = scalar_lea.hbm %s532_s4, 128 }
  0x64   :  { %p369_p9 = scmp.ne.s32.totalorder %s532_s4, %s368_s22  ;;  %p372_p10 = scmp.lt.u32.totalorder %s368_s22, %s532_s4 }
  0x66   :  { %p374_p11 = pnand %p372_p10, %p369_p9 }
  0x68   :  { %377 = shalt.err (!%p374_p11)
}
  0x69   :  { %219 = dma.vmem_to_hbm [thread:$0]  %s217_s0, 128, %s532_s4, [#allocation9]  }
  0x6a   :  { %s378_s28 = scalar_lea.vmem %s227_s18, 128  ;;  %p383_p13 = scmp.lt.s32.totalorder %s227_s18, %s227_s18 }
  0x6b   :  { %p379_p12 = scmp.ne.s32.totalorder %s227_s18, %s378_s28  ;;  %p384_p0 = scmp.lt.s32.totalorder %s378_s28, %s378_s28 }
  0x6d   :  { %p385_p1 = por %p384_p0, %p383_p13 }
  0x6f   :  { %p386_p2 = pnand %p385_p1, %p379_p12 }
  0x71   :  { %389 = shalt.err (!%p386_p2)
}
  0x72   :  { %s390_s6 = scalar_lea.hbm %s533_s5, 128 }
  0x73   :  { %p391_p3 = scmp.ne.s32.totalorder %s533_s5, %s390_s6  ;;  %p394_p4 = scmp.lt.u32.totalorder %s390_s6, %s533_s5 }
  0x75   :  { %p396_p5 = pnand %p394_p4, %p391_p3 }
  0x77   :  { %399 = shalt.err (!%p396_p5)
}
  0x78   :  { %229 = dma.vmem_to_hbm [thread:$0]  %s227_s18, 128, %s533_s5, [#allocation12]  }
  0x79   :  { %404 = dma.done.wait [#allocation4], 128  }
  0x7a   :  { %405 = vsyncadd [#allocation4], 4294967168 }
  0x7b   :  { %406 = dma.done.wait [#allocation9], 256  }
  0x7c   :  { %407 = vsyncadd [#allocation9], 4294967040 }
  0x7d   :  { %408 = dma.done.wait [#allocation12], 128  }
  0x7e   :  { %409 = vsyncadd [#allocation12], 4294967168 }
  0x7f   :  { %242 = vsyncpa [#allocation3], 1 }
  0x80   :  { %243 = vsyncpa [#allocation6], 1 }
  0x81   :  { %244 = vsyncpa [#allocation4], 1 }
  0x82   :  { %245 = vsyncpa [#allocation9], 1 }
  0x83   :  { %246 = vsyncpa [#allocation12], 1 }

</bundles_post_ra>
